<compile_context>
chip_gen: v7x
topology: tpu7x:2x2x1
jax: 0.10.0
libtpu: 0.0.40
codegen_flags: <defaults>
</compile_context>

<pallas_src>
import functools

import jax
import jax.numpy as jnp
from jax import lax
from jax.experimental import pallas as pl
from jax.experimental.pallas import tpu as pltpu


def _round_up(x, m):
    return ((x + m - 1) // m) * m


def _choose_tile(rows_per_part, c, vmem_budget_bytes=16 * 1024 * 1024):
    """Largest row tile whose double-buffered working set fits the VMEM budget."""
    c_pad = _round_up(max(c, 128), 128)
    # per-row bytes: 2x pred tile (double buffer) + 2x target tile + accumulator,
    # all lane-padded to 128, f32/int32.
    bytes_per_row = (2 * c_pad + 2 * 128 + 128) * 4
    tile = vmem_budget_bytes // bytes_per_row
    tile = min(tile, 4096)                          # diminishing returns past this
    tile = min(tile, _round_up(rows_per_part, 8))   # no bigger than the work per core
    tile = max(8, (tile // 8) * 8)
    return int(tile)


def _ls_ce_kernel(pred_ref, tgt_ref, out_ref, acc_ref, *,
                  confidence, smooth_val, n_total, tile, blocks_per_part):
    p = pl.program_id(0)            # core-parallel partial index
    i = pl.program_id(1)            # reduction step within this partial

    @pl.when(i == 0)
    def _():
        acc_ref[...] = jnp.zeros_like(acc_ref)

    x = pred_ref[...].astype(jnp.float32)                    # (tile, C) f32
    c = x.shape[-1]

    # log-sum-exp along the class (lane) dim
    m = jnp.max(x, axis=-1, keepdims=True)                   # (tile, 1)
    lse = m + jnp.log(jnp.sum(jnp.exp(x - m), axis=-1, keepdims=True))

    sum_x = jnp.sum(x, axis=-1, keepdims=True)               # (tile, 1)

    # logit at the target class, without materializing a (tile, C) true_dist
    tgt = tgt_ref[...]                                       # (tile, 1) int32
    cls_ids = lax.broadcasted_iota(jnp.int32, x.shape, 1)
    x_tgt = jnp.sum(jnp.where(cls_ids == tgt, x, 0.0),
                    axis=-1, keepdims=True)                  # (tile, 1)

    # sum_cls(-true_dist * logp) rewritten algebraically:
    #   = -( smooth_val*(sum_x - C*lse) + (confidence - smooth_val)*(x_tgt - lse) )
    row_loss = -(jnp.float32(smooth_val) * (sum_x - jnp.float32(c) * lse)
                 + jnp.float32(confidence - smooth_val) * (x_tgt - lse))

    # mask rows padded past the true batch size
    row_start = (p * blocks_per_part + i) * tile
    row_ids = row_start + lax.broadcasted_iota(jnp.int32, (tile, 1), 0)
    row_loss = jnp.where(row_ids < n_total, row_loss, jnp.float32(0.0))

    # vector accumulator: cheap VPU add per step, single reduce at the very end
    acc_ref[...] += row_loss

    @pl.when(i == pl.num_programs(1) - 1)
    def _():
        total = jnp.sum(acc_ref[...], axis=0, keepdims=True)           # (1, 1)
        out_ref[...] = jnp.broadcast_to(total[None, :, :], (1, 8, 128))


def label_smoothing_cross_entropy(pred, target, *, classes, smoothing=0.0,
                                  tile=None, num_partials=2):
    """Pallas TPU implementation of LabelSmoothingCrossEntropyLoss.forward."""
    n, c = pred.shape
    assert c == classes
    confidence = 1.0 - smoothing
    smooth_val = smoothing / (classes - 1) if classes > 1 else 0.0

    # 2-way batch split so the two TensorCores of a v7x chip each stream half the
    # batch; on single-TC chips (v5e/v6e) the leading "parallel" axis runs serially.
    if n < 2 * 8:
        num_partials = 1
    rows_per_part = pl.cdiv(n, num_partials)

    if tile is None:
        tile = _choose_tile(rows_per_part, c)
    tile = max(8, (min(int(tile), _round_up(rows_per_part, 8)) // 8) * 8)

    blocks_per_part = pl.cdiv(rows_per_part, tile)
    n_pad = num_partials * blocks_per_part * tile

    if n_pad != n:
        pred = jnp.pad(pred, ((0, n_pad - n), (0, 0)))
        target = jnp.pad(target, (0, n_pad - n))
    tgt2d = target.reshape(n_pad, 1).astype(jnp.int32)

    kernel = functools.partial(_ls_ce_kernel,
                               confidence=confidence,
                               smooth_val=smooth_val,
                               n_total=n,
                               tile=tile,
                               blocks_per_part=blocks_per_part)

    # scoped-VMEM budget: double-buffered pred + target tiles, accumulator, output
    c_pad = _round_up(max(c, 128), 128)
    vmem_needed = 4 * (2 * tile * c_pad + 2 * tile * 128 + tile * 128 + 2 * 8 * 128)
    vmem_limit = int(min(max(vmem_needed * 3 // 2, 32 * 1024 * 1024),
                         56 * 1024 * 1024))

    partials = pl.pallas_call(
        kernel,
        out_shape=jax.ShapeDtypeStruct((num_partials, 8, 128), jnp.float32),
        grid_spec=pltpu.PrefetchScalarGridSpec(
            num_scalar_prefetch=0,
            grid=(num_partials, blocks_per_part),
            in_specs=[
                pl.BlockSpec((tile, c),
                             lambda p, i: (p * blocks_per_part + i, 0)),
                pl.BlockSpec((tile, 1),
                             lambda p, i: (p * blocks_per_part + i, 0)),
            ],
            out_specs=pl.BlockSpec((1, 8, 128), lambda p, i: (p, 0, 0)),
            scratch_shapes=[pltpu.VMEM((tile, 1), jnp.float32)],
        ),
        compiler_params=pltpu.CompilerParams(
            dimension_semantics=("parallel", "arbitrary"),
            vmem_limit_bytes=vmem_limit),
    )(pred, tgt2d)

    return jnp.sum(partials[:, 0, 0]) / jnp.float32(n)


def _reference(pred, target, *, classes, smoothing):
    confidence = 1.0 - smoothing
    smooth_val = smoothing / (classes - 1) if classes > 1 else 0.0
    logp = jax.nn.log_softmax(pred, axis=-1)
    true_dist = jnp.full_like(logp, smooth_val)
    true_dist = true_dist.at[jnp.arange(pred.shape[0]), target].set(confidence)
    return jnp.mean(jnp.sum(-true_dist * logp, axis=-1))


if __name__ == "__main__":
    key = jax.random.PRNGKey(0)
    smoothing = 0.1

    # main case: batch=16, classes=10 (classifier-head scale of the ViT-vs-CNN task)
    k1, k2 = jax.random.split(key)
    N, C = 16, 10
    pred = jax.random.normal(k1, (N, C), dtype=jnp.float32)
    target = jax.random.randint(k2, (N,), 0, C, dtype=jnp.int32)

    loss = label_smoothing_cross_entropy(pred, target,
                                         classes=C, smoothing=smoothing)
    loss = jax.block_until_ready(loss)
    ref = _reference(pred, target, classes=C, smoothing=smoothing)
    assert jnp.allclose(loss, ref, atol=1e-5, rtol=1e-5), (loss, ref)

    # ragged batch (exercises the pad + in-kernel row-mask path)
    k3, k4 = jax.random.split(k2)
    N2 = 13
    pred2 = jax.random.normal(k3, (N2, C), dtype=jnp.float32)
    target2 = jax.random.randint(k4, (N2,), 0, C, dtype=jnp.int32)
    loss2 = jax.block_until_ready(
        label_smoothing_cross_entropy(pred2, target2,
                                      classes=C, smoothing=smoothing))
    ref2 = _reference(pred2, target2, classes=C, smoothing=smoothing)
    assert jnp.allclose(loss2, ref2, atol=1e-5, rtol=1e-5), (loss2, ref2)

    print("KERNEL_OK")
</pallas_src>

<mosaic_0001>
module attributes {stable_mosaic.version = 11 : i64} {
  func.func @_ls_ce_kernel(%arg0: i32, %arg1: i32, %arg2: memref<8x10xf32, #tpu.memory_space<vmem>>, %arg3: memref<8x1xi32, #tpu.memory_space<vmem>>, %arg4: memref<1x8x128xf32, #tpu.memory_space<vmem>>, %arg5: memref<8x1xf32, #tpu.memory_space<vmem>>) attributes {dimension_semantics = [#tpu.dimension_semantics<parallel>, #tpu.dimension_semantics<arbitrary>], iteration_bounds = array<i64: 2, 1>, scalar_prefetch = 0 : i64, scratch_operands = 1 : i64, tpu.core_type = #tpu.core_type<tc>, window_params = [{transform_indices = @transform_0, window_bounds = array<i64: 8, 10>}, {transform_indices = @transform_1, window_bounds = array<i64: 8, 1>}, {transform_indices = @transform_2, window_bounds = array<i64: 1, 8, 128>}]} {
    %c0_i32 = arith.constant 0 : i32
    %0 = arith.cmpi eq, %arg1, %c0_i32 : i32
    %1 = arith.extui %0 : i1 to i32
    %c0_i32_0 = arith.constant 0 : i32
    %2 = arith.cmpi ne, %1, %c0_i32_0 : i32
    scf.if %2 {
      %cst_19 = arith.constant 0.000000e+00 : f32
      %50 = vector.broadcast %cst_19 : f32 to vector<8x1xf32>
      %c0_20 = arith.constant 0 : index
      %c0_21 = arith.constant 0 : index
      %51 = vector.load %arg5[%c0_20, %c0_21] : memref<8x1xf32, #tpu.memory_space<vmem>>, vector<8x1xf32>
      tpu.vector_store %arg5[%c0_20, %c0_21], %50 {strides = array<i32>} : memref<8x1xf32, #tpu.memory_space<vmem>>, vector<8x1xf32>,
    } else {
    }
    %c0 = arith.constant 0 : index
    %c0_1 = arith.constant 0 : index
    %3 = vector.load %arg2[%c0, %c0_1] : memref<8x10xf32, #tpu.memory_space<vmem>>, vector<8x10xf32>
    %cst = arith.constant dense<0xFF800000> : vector<8xf32>
    %4 = vector.multi_reduction <maximumf>, %3, %cst [1] : vector<8x10xf32> to vector<8xf32>
    %5 = vector.shape_cast %4 : vector<8xf32> to vector<8x1xf32>
    %6 = vector.broadcast %5 : vector<8x1xf32> to vector<8x10xf32>
    %7 = arith.subf %3, %6 : vector<8x10xf32>
    %8 = math.exp %7 : vector<8x10xf32>
    %cst_2 = arith.constant dense<0.000000e+00> : vector<8xf32>
    %9 = vector.multi_reduction <add>, %8, %cst_2 [1] : vector<8x10xf32> to vector<8xf32>
    %10 = vector.shape_cast %9 : vector<8xf32> to vector<8x1xf32>
    %11 = math.log %10 : vector<8x1xf32>
    %12 = arith.addf %5, %11 : vector<8x1xf32>
    %cst_3 = arith.constant dense<0.000000e+00> : vector<8xf32>
    %13 = vector.multi_reduction <add>, %3, %cst_3 [1] : vector<8x10xf32> to vector<8xf32>
    %14 = vector.shape_cast %13 : vector<8xf32> to vector<8x1xf32>
    %c0_4 = arith.constant 0 : index
    %c0_5 = arith.constant 0 : index
    %15 = vector.load %arg3[%c0_4, %c0_5] : memref<8x1xi32, #tpu.memory_space<vmem>>, vector<8x1xi32>
    %16 = tpu.iota {dimensions = array<i32: 1>} : vector<8x10xi32>
    %17 = vector.broadcast %15 : vector<8x1xi32> to vector<8x10xi32>
    %18 = arith.cmpi eq, %16, %17 : vector<8x10xi32>
    %cst_6 = arith.constant 0.000000e+00 : f32
    %19 = vector.broadcast %cst_6 : f32 to vector<8x10xf32>
    %20 = arith.select %18, %3, %19 : vector<8x10xi1>, vector<8x10xf32>
    %cst_7 = arith.constant dense<0.000000e+00> : vector<8xf32>
    %21 = vector.multi_reduction <add>, %20, %cst_7 [1] : vector<8x10xf32> to vector<8xf32>
    %22 = vector.shape_cast %21 : vector<8xf32> to vector<8x1xf32>
    %cst_8 = arith.constant 1.000000e+01 : f32
    %23 = vector.broadcast %cst_8 : f32 to vector<8x1xf32>
    %24 = arith.mulf %23, %12 : vector<8x1xf32>
    %25 = arith.subf %14, %24 : vector<8x1xf32>
    %cst_9 = arith.constant 0.0111111114 : f32
    %26 = vector.broadcast %cst_9 : f32 to vector<8x1xf32>
    %27 = arith.mulf %26, %25 : vector<8x1xf32>
    %28 = arith.subf %22, %12 : vector<8x1xf32>
    %cst_10 = arith.constant 0.888888895 : f32
    %29 = vector.broadcast %cst_10 : f32 to vector<8x1xf32>
    %30 = arith.mulf %29, %28 : vector<8x1xf32>
    %31 = arith.addf %27, %30 : vector<8x1xf32>
    %cst_11 = arith.constant 0.000000e+00 : f32
    %32 = vector.broadcast %cst_11 : f32 to vector<8x1xf32>
    %33 = arith.subf %32, %31 : vector<8x1xf32>
    %c1_i32 = arith.constant 1 : i32
    %34 = arith.muli %arg0, %c1_i32 : i32
    %35 = arith.addi %34, %arg1 : i32
    %c8_i32 = arith.constant 8 : i32
    %36 = arith.muli %35, %c8_i32 : i32
    %37 = tpu.iota {dimensions = array<i32: 0>} : vector<8x1xi32>
    %38 = vector.broadcast %36 : i32 to vector<8x1xi32>
    %39 = arith.addi %38, %37 : vector<8x1xi32>
    %c16_i32 = arith.constant 16 : i32
    %40 = vector.broadcast %c16_i32 : i32 to vector<8x1xi32>
    %41 = arith.cmpi slt, %39, %40 : vector<8x1xi32>
    %cst_12 = arith.constant 0.000000e+00 : f32
    %42 = vector.broadcast %cst_12 : f32 to vector<8x1xf32>
    %43 = arith.select %41, %33, %42 : vector<8x1xi1>, vector<8x1xf32>
    %c0_13 = arith.constant 0 : index
    %c0_14 = arith.constant 0 : index
    %44 = vector.load %arg5[%c0_13, %c0_14] : memref<8x1xf32, #tpu.memory_space<vmem>>, vector<8x1xf32>
    %45 = arith.addf %44, %43 : vector<8x1xf32>
    %c0_15 = arith.constant 0 : index
    %c0_16 = arith.constant 0 : index
    %46 = vector.load %arg5[%c0_15, %c0_16] : memref<8x1xf32, #tpu.memory_space<vmem>>, vector<8x1xf32>
    tpu.vector_store %arg5[%c0_15, %c0_16], %45 {strides = array<i32>} : memref<8x1xf32, #tpu.memory_space<vmem>>, vector<8x1xf32>,
    %c0_i32_17 = arith.constant 0 : i32
    %47 = arith.cmpi eq, %arg1, %c0_i32_17 : i32
    %48 = arith.extui %47 : i1 to i32
    %c0_i32_18 = arith.constant 0 : i32
    %49 = arith.cmpi ne, %48, %c0_i32_18 : i32
    scf.if %49 {
      %c0_19 = arith.constant 0 : index
      %c0_20 = arith.constant 0 : index
      %50 = vector.load %arg5[%c0_19, %c0_20] : memref<8x1xf32, #tpu.memory_space<vmem>>, vector<8x1xf32>
      %cst_21 = arith.constant dense<0.000000e+00> : vector<1xf32>
      %51 = vector.multi_reduction <add>, %50, %cst_21 [0] : vector<8x1xf32> to vector<1xf32>
      %52 = vector.shape_cast %51 : vector<1xf32> to vector<1x1xf32>
      %53 = vector.shape_cast %52 : vector<1x1xf32> to vector<1x1x1xf32>
      %54 = vector.shape_cast %53 : vector<1x1x1xf32> to vector<1x1x1xf32>
      %55 = vector.broadcast %54 : vector<1x1x1xf32> to vector<1x8x128xf32>
      %c0_22 = arith.constant 0 : index
      %c0_23 = arith.constant 0 : index
      %c0_24 = arith.constant 0 : index
      %56 = vector.load %arg4[%c0_22, %c0_23, %c0_24] : memref<1x8x128xf32, #tpu.memory_space<vmem>>, vector<1x8x128xf32>
      tpu.vector_store %arg4[%c0_22, %c0_23, %c0_24], %55 {strides = array<i32>} : memref<1x8x128xf32, #tpu.memory_space<vmem>>, vector<1x8x128xf32>,
    } else {
    }
    return
  }
  func.func @transform_0(%arg0: i32, %arg1: i32) -> (i32, i32) {
    %c1_i32 = arith.constant 1 : i32
    %0 = arith.muli %arg0, %c1_i32 : i32
    %1 = arith.addi %0, %arg1 : i32
    %c0_i32 = arith.constant 0 : i32
    %c0_i32_0 = arith.constant 0 : i32
    return %1, %c0_i32 : i32, i32
  }
  func.func @transform_1(%arg0: i32, %arg1: i32) -> (i32, i32) {
    %c1_i32 = arith.constant 1 : i32
    %0 = arith.muli %arg0, %c1_i32 : i32
    %1 = arith.addi %0, %arg1 : i32
    %c0_i32 = arith.constant 0 : i32
    %c0_i32_0 = arith.constant 0 : i32
    return %1, %c0_i32 : i32, i32
  }
  func.func @transform_2(%arg0: i32, %arg1: i32) -> (i32, i32, i32) {
    %c0_i32 = arith.constant 0 : i32
    %c0_i32_0 = arith.constant 0 : i32
    %c0_i32_1 = arith.constant 0 : i32
    return %arg0, %c0_i32, %c0_i32_0 : i32, i32, i32
  }
}

</mosaic_0001>

<bundles_post_ra>
// kernel: tpu_custom_call.1
= control target key start
LH: loop header
LB: loop body
LE: loop exit
PB: predicated region body
PF: predicated region fallthrough
CT: control target
= control target key end

     0   :  { %7 = vsyncpa [#allocation4], 0  ;;  %s642_s0 = inlined_call_operand.vmem [shape: f32[16,10], index: 0, kind: input, shape index: {}]   ;;  %s643_s1 = inlined_call_operand.vmem [shape: s32[16,1], index: 1, kind: input, shape index: {}]   ;;  %s644_s2 = inlined_call_operand.hbm [shape: f32[2,8,128], index: 2, kind: output, shape index: {}]  }
   0x1   :  { %9 = vsyncpa [#allocation4 + $0x1], 0  ;;  %s519_s9 = smov 0   ;;  %s521_s10 = smov 0  }
   0x2   :  { %s523_s11 = smov 0   ;;  %s525_s12 = smov 0  }
   0x3   :  { %s527_s13 = smov 0   ;;  %s529_s14 = smov 0  }
   0x4 LB: > { %s345_s15 = sadd.s32 4294967295, %s499_s14   ;;  %s346_s16 = sadd.s32 4294967294, %s499_s14   ;;  %s499_s14 = sphi %s529_s14, %s15_s14   ;;  %s495_s13 = sphi %s527_s13, %s651_s13   ;;  %s491_s12 = sphi %s525_s12, %s650_s12   ;;  %s487_s11 = sphi %s523_s11, %s649_s11   ;;  %s483_s10 = sphi %s521_s10, %s648_s10   ;;  %s479_s9 = sphi %s519_s9, %s647_s9  }
   0x5   : > { %s27_s17 = sadd.s32 1, %s495_s13  ;;  %s90_s18 = sadd.s32 1, %s487_s11 }
   0x6   : > { %p29_p0 = scmp.ge.s32.totalorder %s27_s17, 2  ;;  %p100_p1 = scmp.ne.s32.totalorder %s487_s11, %s483_s10 }
   0x7   : > { %p101_p2 = scmp.eq.s32.totalorder %s345_s15, 1  ;;  %p106_p3 = scmp.ne.s32.totalorder %s483_s10, %s479_s9 }
   0x8   : > { %s653_s17 = smov (%p29_p0, %s27_s17), 0  ;;  %p107_p5 = scmp.eq.s32.totalorder %s346_s16, 1 }
   0x9   : > { %p559_p4 = por %p101_p2, %p100_p1  ;;  %s87_s20 = ssub.s32 %s495_s13, %s653_s17 }
   0xa   : > { %p349_p6 = scmp.ge.s32.totalorder %s499_s14, 1  ;;  %p88_p7 = scmp.eq.s32.totalorder %s87_s20, 0 }
   0xb   : > { %p566_p8 = por %p107_p5, %p106_p3  ;;  %p143_p9 = scmp.lt.s32.totalorder %s499_s14, 3 }
   0xc   : > { %s572_s22 = scalar_select %p88_p7, %s487_s11, %s90_s18  }
   0xd   : > { %p144_p10 = pnand %p349_p6, %p143_p9 }
   0xe   : > { %p171_p11 = scmp.lt.s32.totalorder (!%p144_p10), %s491_s12, 1  ;;  %v501_v0 = vmov (!%p144_p10), 0   ;;  %vm189_vm0 = vcmask (!%p144_p10), 80896   ;;  %v206_v7 = vlaneseq (!%p144_p10)  ;;  %vm186_vm2 = vcmask (!%p144_p10), 7168   ;;  %s353_s3 = sshll.u32 (!%p144_p10), %s491_s12, 3 }
   0xf   : > { %147 = sbr.rel (%p144_p10) target bundleno = 519 (0x207), region = 28  ;;  %415 = vset.pattern.permute.xlu0 (!%p144_p10), %v501_v0  ;;  %416 = vset.pattern.permute.xlu1 (!%p144_p10), %v501_v0  ;;  %v502_v15 = vmov (!%p144_p10), 0.0   ;;  %v227_v24 = vstv (!%p144_p10), %s353_s3  ;;  %s167_s4 = sand.u32 (!%p144_p10), 1, %s483_s10  }
  0x10   : > { %v207_v8 = vand.u32 (!%p144_p10), 127, %v206_v7  ;;  %187 = vst.msk [vmem:[#allocation2] sm:$0xff] (!%p144_p10), %vm186_vm2, %v502_v15  ;;  %v226_v22 = vshrl.u32 (!%p144_p10), %v206_v7, 7  ;;  %s350_s5 = sshll.u32 (!%p144_p10), %s167_s4, 3  ;;  %s355_s8 = sshll.u32 (!%p144_p10), %s491_s12, 7 }
  0x11   : > { %s169_s6 = scalar_lea.vmem (!%p144_p10), [#allocation3], %s350_s5  ;;  %s597_s18 = scalar_lea.hbm (!%p144_p10), %s644_s2, %s355_s8 }
  0x12   : > { %v228_v27 = vadd.s32 (!%p144_p10), %v227_v24, %v226_v22  ;;  %s266_s7 = sshll.u32 (!%p144_p10), %s169_s6, 4  ;;  %s253_s20 = scalar_lea.sflag (!%p144_p10), [#allocation4], %s167_s4  ;;  %s592_s7 = int_to_ptr.vmem [resolvable:$true] %s266_s7 }
  0x14   : > { %vm229_vm3 = vcmp.lt.s32.totalorder (!%p144_p10), %v228_v27, 16 }
  0x16   : > { %s172_s23 = scalar_select %p171_p11, %s491_s12, 1 }
  0x17   : > { %v231_v31 = vld [vmem:[#allocation2] sm:$0xff] }
  0x18   : > { %s351_s24 = sshll.u32 %s172_s23, 3  ;;  %s421_s23 = scalar_lea.vmem %s592_s7, 128 }
  0x19   : > { %s174_s27 = scalar_lea.vmem %s642_s0, %s351_s24  ;;  %s180_s30 = scalar_lea.vmem %s643_s1, %s351_s24 }
  0x1a   : > { %v188_v1 = vld [vmem:[%s174_s27] sm:$0xff]  ;;  %p422_p12 = scmp.ne.s32.totalorder %s592_s7, %s421_s23  ;;  %s503_s24 = smov [#allocation3]  }
  0x1b   : > { %v190_v2 = vsel %vm189_vm0, %v188_v1, -inf  ;;  %v205_v3 = vld [vmem:[%s180_s30] sm:$0xff]  ;;  %v202_v12 = vsel %vm189_vm0, %v188_v1, 0.0  ;;  %s425_s12 = sshll.u32 %s503_s24, 4  ;;  %s426_s12 = int_to_ptr.vmem [resolvable:$false] %s425_s12 }
  0x1c   : > { %191 = vmax.xlane.f32.xlu0 %v190_v2  ;;  %p423_p13 = pnand %p422_p12, %p559_p4  ;;  %s427_s25 = scalar_lea.vmem %s426_s12, 256 }
  0x1d   : > { %p428_p1 = scmp.lt.s32.totalorder %s592_s7, %s426_s12  ;;  %p429_p2 = scmp.lt.s32.totalorder %s427_s25, %s421_s23 }
  0x1e   : > { %p424_p0 = pneg %p423_p13 }
  0x1f   : > { %p430_p3 = por %p429_p2, %p428_p1 }
  0x21   : > { %p431_p5 = pnand %p430_p3, %p424_p0 }
  0x32   : > { %209 = vperm.xlu0 %415, %v205_v3  }
  0xa9   : > { %v192_v4 = vpop.xlane.xlu0 %191 }
  0xaa   : > { %v193_v5 = vsub.f32 %v188_v1, %v192_v4 }
  0xac   : > { %v194_v6 = vmul.f32 1.442695, %v193_v5 }
  0xae   : > { %417 = vpow2.f32 %v194_v6 }
  0xb1   : > { %v210_v9 = vpop.permute.xlu0 %209 }
  0xb2   : > { %vm211_vm1 = vcmp.eq.s32.totalorder %v207_v8, %v210_v9 }
  0xb3   : > { %v212_v13 = vsel %vm211_vm1, %v188_v1, 0.0 }
  0xb4   : > { %v213_v14 = vsel %vm189_vm0, %v212_v13, 0.0 }
  0xb8   : > { %v418_v10 = vpop.eup %417 }
  0xb9   : > { %v196_v11 = vsel %vm189_vm0, %v418_v10, 0.0 }
  0xba   : > { %197 = vadd.xlane.f32.xlu1 %v196_v11 }
  0xbe   : > { %203 = vadd.xlane.f32.xlu1 %v202_v12 }
  0xc2   : > { %214 = vadd.xlane.f32.xlu1 %v213_v14 }
 0x147   : > { %v198_v16 = vpop.xlane.xlu1 %197 }
 0x148   : > { %419 = vlog2.f32 %v198_v16 }
 0x14b   : > { %v204_v17 = vpop.xlane.xlu1 %203 }
 0x14f   : > { %v215_v20 = vpop.xlane.xlu1 %214 }
 0x152   : > { %v420_v18 = vpop.eup %419 }
 0x153   : > { %v200_v19 = vmul.f32 0.6931472, %v420_v18 }
 0x155   : > { %v201_v21 = vadd.f32 %v200_v19, %v192_v4 }
 0x157   : > { %v216_v23 = vmul.f32 10.0, %v201_v21  ;;  %v219_v25 = vsub.f32 %v215_v20, %v201_v21 }
 0x159   : > { %v217_v26 = vsub.f32 %v204_v17, %v216_v23  ;;  %v220_v29 = vmul.f32 0.8888889, %v219_v25 }
 0x15b   : > { %v218_v28 = vmul.f32 0.011111111, %v217_v26 }
 0x15d   : > { %v221_v30 = vadd.f32 %v220_v29, %v218_v28 }
 0x15f   : > { %v222_v32 = vsub.f32 0.0, %v221_v30 }
 0x161   : > { %v230_v33 = vsel %vm229_vm3, %v222_v32, 0.0 }
 0x162   : > { %v232_v34 = vadd.f32 %v231_v31, %v230_v33 }
 0x164   : > { %234 = vst.msk [vmem:[#allocation2] sm:$0xff] %vm186_vm2, %v232_v34 }
 0x16b   : > { %v238_v35 = vld [vmem:[#allocation2] sm:$0xff] }
 0x16c   : > { %v239_v36 = vsel %vm186_vm2, %v238_v35, 0.0 }
 0x16d   : > { %v240_v37 = vrot.slane %v239_v36, 4 }
 0x16f   : > { %v241_v38 = vadd.f32 %v240_v37, %v239_v36 }
 0x171   : > { %v242_v39 = vrot.slane %v241_v38, 2 }
 0x173   : > { %v243_v40 = vadd.f32 %v242_v39, %v241_v38 }
 0x175   : > { %v244_v41 = vrot.slane %v243_v40, 1 }
 0x177   : > { %v245_v42 = vadd.f32 %v244_v41, %v243_v40 }
 0x179   : > { %248 = vperm.xlu1 %416, %v245_v42  }
 0x1f8   : > { %v249_v43 = vpop.permute.xlu1 %248 }
 0x1f9   : > { %251 = vst [vmem:[%s169_s6] sm:$0xff] %v249_v43 }
 0x1fa   : > { %434 = shalt.err (!%p431_p5)
}
 0x1fb   : > { %s435_s26 = scalar_lea.hbm %s597_s18, 128  ;;  %s439_s29 = scalar_lea.hbm %s644_s2, 256 }
 0x1fc   : > { %p436_p6 = scmp.ne.s32.totalorder %s597_s18, %s435_s26  ;;  %p440_p10 = scmp.lt.u32.totalorder %s597_s18, %s644_s2 }
 0x1fd   : > { %p441_p11 = scmp.lt.u32.totalorder %s439_s29, %s435_s26  ;;  %p443_p13 = scmp.lt.u32.totalorder %s435_s26, %s597_s18 }
 0x1fe   : > { %p437_p7 = pnand %p436_p6, %p559_p4 }
 0x1ff   : > { %p442_p12 = por %p441_p11, %p440_p10 }
 0x200   : > { %p438_p9 = pneg %p437_p7 }
 0x201   : > { %p444_p0 = por %p443_p13, %p442_p12 }
 0x203   : > { %p445_p1 = pnand %p444_p0, %p438_p9 }
 0x205   : > { %448 = shalt.err (!%p445_p1)
}
 0x206   : > { %358 = dma.vmem_to_hbm [thread:$0]  (%p559_p4), %s592_s7, 128, %s597_s18, %s253_s20  }
 0x207 PF: > { %p364_p2 = scmp.ge.s32.totalorder %s499_s14, 2  ;;  %s278_s4 = sand.u32 1, %s479_s9  }
 0x208   : > { %s279_s5 = scalar_lea.sflag [#allocation4], %s278_s4 }
 0x209   : > { %p361_p3 = pnand %p364_p2, %p566_p8 }
 0x20b   : > { %474 = dma.done.wait (!%p361_p3), %s279_s5, 128  }
 0x20c   : > { %476 = vsyncadd (!%p361_p3), %s279_s5, 4294967168  ;;  %s15_s14 = sadd.s32 1, %s499_s14   ;;  %s647_s9 = smov %s483_s10 }
 0x20d   : > { %p12_p5 = scmp.ge.s32.totalorder %s15_s14, 4   ;;  %s648_s10 = smov %s487_s11 }
 0x20e   : > { %s649_s11 = smov %s572_s22  ;;  %s650_s12 = smov %s495_s13 }
 0x20f   : > { %s651_s13 = smov %s653_s17  ;;  %14 = sbr.rel (!%p12_p5) target bundleno = 4 (0x4), region = 74 }
 0x216   :  { %284 = vsyncpa [#allocation4], 1 }
 0x217   :  { %286 = vsyncpa [#allocation4 + $0x1], 1 }

</bundles_post_ra>
